<compile_context>
chip_gen: v7x
topology: tpu7x:2x2x1
jax: 0.10.0
libtpu: 0.0.40
codegen_flags: <defaults>
</compile_context>

<pallas_src>
import functools

import jax
import jax.numpy as jnp
from jax.experimental import pallas as pl
from jax.experimental.pallas import tpu as pltpu


def _round_up(n, m):
    return ((n + m - 1) // m) * m


# Lane-dense padded feature dims (multiples of 128).
D_IN = 384    # 309 -> 384
D_MID1 = 128  # 100 -> 128  (output of folded encoder chain W12)
D_MID2 = 256  # 200 -> 256  (output of folded chain W345)
D_OUT = 384   # 309 -> 384


def autoencoder_kernel(x_ref,
                       w12_ref, b12_ref,
                       w345_ref, b345_ref,
                       w6_ref, b6_ref,
                       o_ref,
                       *, compute_dtype):
    """Folded AE forward on one batch tile.

    All matmuls run on the MXU with f32 accumulation; bias / ReLU / tanh
    epilogues are f32 on the VPU/EUP.
    """
    # x_ref already arrives in compute_dtype (bf16 by default).
    h = jnp.dot(x_ref[...], w12_ref[...],
                preferred_element_type=jnp.float32) + b12_ref[...]   # (TILE_B, 128)
    h = jnp.maximum(h, 0.0)                                          # ReLU

    h = jnp.dot(h.astype(compute_dtype), w345_ref[...],
                preferred_element_type=jnp.float32) + b345_ref[...]  # (TILE_B, 256)
    h = jnp.maximum(h, 0.0)                                          # ReLU

    h = jnp.dot(h.astype(compute_dtype), w6_ref[...],
                preferred_element_type=jnp.float32) + b6_ref[...]    # (TILE_B, 384)
    o_ref[...] = jnp.tanh(h).astype(o_ref.dtype)                     # Tanh


@functools.partial(jax.jit, static_argnames=("compute_dtype", "unpad"))
def autoencoder_forward(x, params, *, compute_dtype=jnp.bfloat16, unpad=True):
    """x: (B, 309) float32.  params: list of (W_t, b), W_t shaped (in, out), b shaped (1, out).

    Returns (B, 309) f32 if unpad=True, else the padded (Bp, 384) kernel output.
    """
    (w1, b1), (w2, b2), (w3, b3), (w4, b4), (w5, b5), (w6, b6) = params
    B, F_in = x.shape
    assert F_in == 309

    hi = jax.lax.Precision.HIGHEST

    # ---- offline folding of the activation-free Linear chains (exact up to fp reassoc) ----
    w12 = jnp.dot(w1, w2, precision=hi)                                   # (309, 100)
    b12 = jnp.dot(b1, w2, precision=hi) + b2                              # (1, 100)
    w345 = jnp.dot(jnp.dot(w3, w4, precision=hi), w5, precision=hi)       # (100, 200)
    b345 = jnp.dot(jnp.dot(b3, w4, precision=hi) + b4, w5, precision=hi) + b5  # (1, 200)

    def pad2(a, r, c):
        return jnp.pad(a, ((0, r - a.shape[0]), (0, c - a.shape[1])))

    w12p = pad2(w12, D_IN, D_MID1).astype(compute_dtype)
    b12p = pad2(b12, 1, D_MID1)                       # biases stay f32
    w345p = pad2(w345, D_MID1, D_MID2).astype(compute_dtype)
    b345p = pad2(b345, 1, D_MID2)
    w6p = pad2(w6, D_MID2, D_OUT).astype(compute_dtype)
    b6p = pad2(b6, 1, D_OUT)

    flat = [w12p, b12p, w345p, b345p, w6p, b6p]

    # ---- batch tiling: 512-row tiles (>=2 grid steps for large batches) ----
    TILE_B = 512 if B >= 512 else _round_up(B, 8)
    Bp = _round_up(B, TILE_B)

    # Pad + cast the input once; fused by XLA inside this jit.
    xp = jnp.pad(x, ((0, Bp - B), (0, D_IN - F_in))).astype(compute_dtype)

    def resident(a):
        # Full-array block, constant index_map: stays in VMEM across grid steps.
        nd = a.ndim
        return pl.BlockSpec(a.shape, lambda i, _nd=nd: (0,) * _nd)

    grid = (Bp // TILE_B,)

    flops = 2 * Bp * (D_IN * D_MID1 + D_MID1 * D_MID2 + D_MID2 * D_OUT)
    bytes_accessed = (xp.size * xp.dtype.itemsize
                      + sum(int(a.size) * a.dtype.itemsize for a in flat)
                      + Bp * D_OUT * 4)

    out = pl.pallas_call(
        functools.partial(autoencoder_kernel, compute_dtype=compute_dtype),
        out_shape=jax.ShapeDtypeStruct((Bp, D_OUT), jnp.float32),
        grid=grid,
        in_specs=[pl.BlockSpec((TILE_B, D_IN), lambda i: (i, 0))]
                 + [resident(a) for a in flat],
        out_specs=pl.BlockSpec((TILE_B, D_OUT), lambda i: (i, 0)),
        compiler_params=pltpu.CompilerParams(
            dimension_semantics=("parallel",),        # v7x: shard batch tiles across both TCs
            vmem_limit_bytes=32 * 1024 * 1024),
        cost_estimate=pl.CostEstimate(
            flops=flops,
            transcendentals=Bp * D_OUT,
            bytes_accessed=bytes_accessed),
    )(xp, *flat)

    if unpad:
        return out[:B, :309]
    return out


def init_linear(key, fan_in, fan_out):
    """Deterministic init mimicking PyTorch nn.Linear default U(-1/sqrt(fan_in), 1/sqrt(fan_in))."""
    kw, kb = jax.random.split(key)
    bound = 1.0 / jnp.sqrt(jnp.float32(fan_in))
    # stored pre-transposed: (in, out)
    w_t = jax.random.uniform(kw, (fan_in, fan_out), jnp.float32, -bound, bound)
    b = jax.random.uniform(kb, (1, fan_out), jnp.float32, -bound, bound)
    return w_t, b


def reference_forward(x, params):
    (w1, b1), (w2, b2), (w3, b3), (w4, b4), (w5, b5), (w6, b6) = params
    h = x @ w1 + b1
    h = h @ w2 + b2
    h = jnp.maximum(h, 0.0)
    h = h @ w3 + b3
    h = h @ w4 + b4
    h = h @ w5 + b5
    h = jnp.maximum(h, 0.0)
    h = h @ w6 + b6
    return jnp.tanh(h)


if __name__ == "__main__":
    key = jax.random.PRNGKey(0)
    keys = jax.random.split(key, 8)

    # layer dims follow the module: enc 309->200->100->1, dec 1->100->200->309
    dims = [(309, 200), (200, 100), (100, 1), (1, 100), (100, 200), (200, 309)]
    params = [init_linear(keys[i], fi, fo) for i, (fi, fo) in enumerate(dims)]

    # Small batch (single tile).
    B = 8
    x = jax.random.normal(keys[6], (B, 309), jnp.float32)
    ref = reference_forward(x, params)

    # Default path: bf16 MXU operands, f32 accumulation / epilogue.
    out = jax.block_until_ready(autoencoder_forward(x, params))
    assert out.shape == (B, 309)
    assert bool(jnp.all(jnp.isfinite(out)))
    assert jnp.allclose(out, ref, atol=1e-1, rtol=1e-1), "bf16 mismatch vs reference"

    # f32-operand path: tight validation of padding + layer folding.
    out_f32 = jax.block_until_ready(
        autoencoder_forward(x, params, compute_dtype=jnp.float32))
    assert jnp.allclose(out_f32, ref, atol=1e-3, rtol=1e-3), "f32 mismatch vs reference"

    # Larger, non-multiple batch exercises 512-row tiles + multi-step parallel grid.
    B2 = 600
    x2 = jax.random.normal(keys[7], (B2, 309), jnp.float32)
    ref2 = reference_forward(x2, params)
    out2 = jax.block_until_ready(autoencoder_forward(x2, params))
    assert out2.shape == (B2, 309)
    assert jnp.allclose(out2, ref2, atol=1e-1, rtol=1e-1), "tiled bf16 mismatch vs reference"

    print("KERNEL_OK")
</pallas_src>

<mosaic_0001>
module attributes {stable_mosaic.version = 11 : i64} {
  func.func @autoencoder_kernel(%arg0: i32, %arg1: memref<8x384xbf16, #tpu.memory_space<vmem>>, %arg2: memref<384x128xbf16, #tpu.memory_space<vmem>>, %arg3: memref<1x128xf32, #tpu.memory_space<vmem>>, %arg4: memref<128x256xbf16, #tpu.memory_space<vmem>>, %arg5: memref<1x256xf32, #tpu.memory_space<vmem>>, %arg6: memref<256x384xbf16, #tpu.memory_space<vmem>>, %arg7: memref<1x384xf32, #tpu.memory_space<vmem>>, %arg8: memref<8x384xf32, #tpu.memory_space<vmem>>) attributes {dimension_semantics = [#tpu.dimension_semantics<parallel>], iteration_bounds = array<i64: 1>, scalar_prefetch = 0 : i64, scratch_operands = 0 : i64, tpu.core_type = #tpu.core_type<tc>, window_params = [{transform_indices = @transform_0, window_bounds = array<i64: 8, 384>}, {pipeline_mode = #tpu.pipeline_mode<synchronous>, transform_indices = @transform_1, window_bounds = array<i64: 384, 128>}, {pipeline_mode = #tpu.pipeline_mode<synchronous>, transform_indices = @transform_2, window_bounds = array<i64: 1, 128>}, {pipeline_mode = #tpu.pipeline_mode<synchronous>, transform_indices = @transform_3, window_bounds = array<i64: 128, 256>}, {pipeline_mode = #tpu.pipeline_mode<synchronous>, transform_indices = @transform_4, window_bounds = array<i64: 1, 256>}, {pipeline_mode = #tpu.pipeline_mode<synchronous>, transform_indices = @transform_5, window_bounds = array<i64: 256, 384>}, {pipeline_mode = #tpu.pipeline_mode<synchronous>, transform_indices = @transform_6, window_bounds = array<i64: 1, 384>}, {transform_indices = @transform_7, window_bounds = array<i64: 8, 384>}]} {
    %c0 = arith.constant 0 : index
    %c0_0 = arith.constant 0 : index
    %0 = vector.load %arg1[%c0, %c0_0] : memref<8x384xbf16, #tpu.memory_space<vmem>>, vector<8x384xbf16>
    %c0_1 = arith.constant 0 : index
    %c0_2 = arith.constant 0 : index
    %1 = vector.load %arg2[%c0_1, %c0_2] : memref<384x128xbf16, #tpu.memory_space<vmem>>, vector<384x128xbf16>
    %cst = arith.constant dense<0.000000e+00> : vector<8x128xf32>
    %2 = tpu.matmul %0, %1, %cst {dimension_numbers = #tpu.dot_dimension_numbers<[1], [0], [0], [1], [0, 0, 1, 1], [], []>} : vector<8x384xbf16>, vector<384x128xbf16>, vector<8x128xf32> -> vector<8x128xf32>
    %c0_3 = arith.constant 0 : index
    %c0_4 = arith.constant 0 : index
    %3 = vector.load %arg3[%c0_3, %c0_4] : memref<1x128xf32, #tpu.memory_space<vmem>>, vector<1x128xf32>
    %4 = vector.broadcast %3 : vector<1x128xf32> to vector<8x128xf32>
    %5 = arith.addf %2, %4 : vector<8x128xf32>
    %cst_5 = arith.constant 0.000000e+00 : f32
    %6 = vector.broadcast %cst_5 : f32 to vector<8x128xf32>
    %7 = arith.maximumf %5, %6 : vector<8x128xf32>
    %8 = arith.truncf %7 : vector<8x128xf32> to vector<8x128xbf16>
    %c0_6 = arith.constant 0 : index
    %c0_7 = arith.constant 0 : index
    %9 = vector.load %arg4[%c0_6, %c0_7] : memref<128x256xbf16, #tpu.memory_space<vmem>>, vector<128x256xbf16>
    %cst_8 = arith.constant dense<0.000000e+00> : vector<8x256xf32>
    %10 = tpu.matmul %8, %9, %cst_8 {dimension_numbers = #tpu.dot_dimension_numbers<[1], [0], [0], [1], [0, 0, 1, 1], [], []>} : vector<8x128xbf16>, vector<128x256xbf16>, vector<8x256xf32> -> vector<8x256xf32>
    %c0_9 = arith.constant 0 : index
    %c0_10 = arith.constant 0 : index
    %11 = vector.load %arg5[%c0_9, %c0_10] : memref<1x256xf32, #tpu.memory_space<vmem>>, vector<1x256xf32>
    %12 = vector.broadcast %11 : vector<1x256xf32> to vector<8x256xf32>
    %13 = arith.addf %10, %12 : vector<8x256xf32>
    %cst_11 = arith.constant 0.000000e+00 : f32
    %14 = vector.broadcast %cst_11 : f32 to vector<8x256xf32>
    %15 = arith.maximumf %13, %14 : vector<8x256xf32>
    %16 = arith.truncf %15 : vector<8x256xf32> to vector<8x256xbf16>
    %c0_12 = arith.constant 0 : index
    %c0_13 = arith.constant 0 : index
    %17 = vector.load %arg6[%c0_12, %c0_13] : memref<256x384xbf16, #tpu.memory_space<vmem>>, vector<256x384xbf16>
    %cst_14 = arith.constant dense<0.000000e+00> : vector<8x384xf32>
    %18 = tpu.matmul %16, %17, %cst_14 {dimension_numbers = #tpu.dot_dimension_numbers<[1], [0], [0], [1], [0, 0, 1, 1], [], []>} : vector<8x256xbf16>, vector<256x384xbf16>, vector<8x384xf32> -> vector<8x384xf32>
    %c0_15 = arith.constant 0 : index
    %c0_16 = arith.constant 0 : index
    %19 = vector.load %arg7[%c0_15, %c0_16] : memref<1x384xf32, #tpu.memory_space<vmem>>, vector<1x384xf32>
    %20 = vector.broadcast %19 : vector<1x384xf32> to vector<8x384xf32>
    %21 = arith.addf %18, %20 : vector<8x384xf32>
    %22 = math.tanh %21 : vector<8x384xf32>
    %c0_17 = arith.constant 0 : index
    %c0_18 = arith.constant 0 : index
    %23 = vector.load %arg8[%c0_17, %c0_18] : memref<8x384xf32, #tpu.memory_space<vmem>>, vector<8x384xf32>
    tpu.vector_store %arg8[%c0_17, %c0_18], %22 {strides = array<i32>} : memref<8x384xf32, #tpu.memory_space<vmem>>, vector<8x384xf32>,
    return
  }
  func.func @transform_0(%arg0: i32) -> (i32, i32) {
    %c0_i32 = arith.constant 0 : i32
    %c0_i32_0 = arith.constant 0 : i32
    return %arg0, %c0_i32 : i32, i32
  }
  func.func @transform_1(%arg0: i32) -> (i32, i32) {
    %c0_i32 = arith.constant 0 : i32
    %c0_i32_0 = arith.constant 0 : i32
    %c0_i32_1 = arith.constant 0 : i32
    return %c0_i32, %c0_i32_0 : i32, i32
  }
  func.func @transform_2(%arg0: i32) -> (i32, i32) {
    %c0_i32 = arith.constant 0 : i32
    %c0_i32_0 = arith.constant 0 : i32
    %c0_i32_1 = arith.constant 0 : i32
    return %c0_i32, %c0_i32_0 : i32, i32
  }
  func.func @transform_3(%arg0: i32) -> (i32, i32) {
    %c0_i32 = arith.constant 0 : i32
    %c0_i32_0 = arith.constant 0 : i32
    %c0_i32_1 = arith.constant 0 : i32
    return %c0_i32, %c0_i32_0 : i32, i32
  }
  func.func @transform_4(%arg0: i32) -> (i32, i32) {
    %c0_i32 = arith.constant 0 : i32
    %c0_i32_0 = arith.constant 0 : i32
    %c0_i32_1 = arith.constant 0 : i32
    return %c0_i32, %c0_i32_0 : i32, i32
  }
  func.func @transform_5(%arg0: i32) -> (i32, i32) {
    %c0_i32 = arith.constant 0 : i32
    %c0_i32_0 = arith.constant 0 : i32
    %c0_i32_1 = arith.constant 0 : i32
    return %c0_i32, %c0_i32_0 : i32, i32
  }
  func.func @transform_6(%arg0: i32) -> (i32, i32) {
    %c0_i32 = arith.constant 0 : i32
    %c0_i32_0 = arith.constant 0 : i32
    %c0_i32_1 = arith.constant 0 : i32
    return %c0_i32, %c0_i32_0 : i32, i32
  }
  func.func @transform_7(%arg0: i32) -> (i32, i32) {
    %c0_i32 = arith.constant 0 : i32
    %c0_i32_0 = arith.constant 0 : i32
    return %arg0, %c0_i32 : i32, i32
  }
}

</mosaic_0001>

<bundles_post_ra>
// kernel: autoencoder_forward.1
= control target key start
LH: loop header
LB: loop body
LE: loop exit
PB: predicated region body
PF: predicated region fallthrough
CT: control target
= control target key end

     0   :  { %v1227_v2 = vmov 0.0   ;;  %vm1228_vm0 = vmmov 0   ;;  %s1562_s0 = inlined_call_operand.vmem [shape: bf16[8,384], index: 0, kind: input, shape index: {}]   ;;  %s1563_s1 = inlined_call_operand.vmem [shape: bf16[384,128], index: 1, kind: input, shape index: {}]   ;;  %s1564_s2 = inlined_call_operand.vmem [shape: f32[1,128], index: 2, kind: input, shape index: {}]   ;;  %s1565_s3 = inlined_call_operand.vmem [shape: bf16[128,256], index: 3, kind: input, shape index: {}]   ;;  %s1566_s4 = inlined_call_operand.vmem [shape: f32[1,256], index: 4, kind: input, shape index: {}]   ;;  %s1567_s5 = inlined_call_operand.vmem [shape: bf16[256,384], index: 5, kind: input, shape index: {}]   ;;  %s1568_s6 = inlined_call_operand.vmem [shape: f32[1,384], index: 6, kind: input, shape index: {}]   ;;  %s1569_s7 = inlined_call_operand.hbm [shape: f32[8,384], index: 7, kind: output, shape index: {}]  }
   0x1   :  { %v1082_v0 = vld [vmem:[%s1563_s1 + $0x40] sm:$0xff]   ;;  %1058 = vmatprep.subr.bf16.mxu1 %v1227_v2  ;;  %1074 = vmatprep.mubr.msk.bf16.mxu1 %vm1228_vm0, %v1227_v2  ;;  %v1085_v4 = vld [vmem:[%s1563_s1 + $0x48] sm:$0xff]   ;;  %v1088_v7 = vld [vmem:[%s1563_s1 + $0x50] sm:$0xff]  }
   0x2   :  { %v1083_v1 = vld [vmem:[%s1563_s1] sm:$0xff]   ;;  %1005 = vmatprep.subr.bf16.mxu0 %v1082_v0  ;;  %v1086_v5 = vld [vmem:[%s1563_s1 + $0x8] sm:$0xff]   ;;  %v1089_v8 = vld [vmem:[%s1563_s1 + $0x10] sm:$0xff]  }
   0x3   :  { %v1084_v3 = vld [vmem:[%s1563_s1 + $0x80] sm:$0xff]   ;;  %1006 = vmatpush3.bf16.msra.mxu0 %v1083_v1  ;;  %v1087_v6 = vld [vmem:[%s1563_s1 + $0x88] sm:$0xff]   ;;  %v1090_v9 = vld [vmem:[%s1563_s1 + $0x90] sm:$0xff]  }
   0x4   :  { %1059 = vmatpush3.bf16.msra.mxu1 %v1084_v3  ;;  %1007 = vmatprep.subr.bf16.mxu0 %v1085_v4  ;;  %v1091_v10 = vld [vmem:[%s1563_s1 + $0x58] sm:$0xff]   ;;  %v1094_v13 = vld [vmem:[%s1563_s1 + $0x60] sm:$0xff]   ;;  %v1097_v16 = vld [vmem:[%s1563_s1 + $0x68] sm:$0xff]  }
   0x5   :  { %1060 = vmatprep.subr.bf16.mxu1 %v1227_v2  ;;  %v1092_v11 = vld [vmem:[%s1563_s1 + $0x18] sm:$0xff]   ;;  %v1095_v14 = vld [vmem:[%s1563_s1 + $0x20] sm:$0xff]   ;;  %v1098_v17 = vld [vmem:[%s1563_s1 + $0x28] sm:$0xff]  }
   0x6   :  { %v1093_v12 = vld [vmem:[%s1563_s1 + $0x98] sm:$0xff]   ;;  %v1096_v15 = vld [vmem:[%s1563_s1 + $0xa0] sm:$0xff]   ;;  %v1099_v18 = vld [vmem:[%s1563_s1 + $0xa8] sm:$0xff]  }
   0x7   :  { %1008 = vmatpush3.bf16.msra.mxu0 %v1086_v5  ;;  %v1100_v19 = vld [vmem:[%s1563_s1 + $0x70] sm:$0xff]   ;;  %v28_v21 = vld [vmem:[%s1562_s0] sm:$0xff]  ;;  %v1103_v23 = vld [vmem:[%s1563_s1 + $0x78] sm:$0xff]  }
   0x8   :  { %1061 = vmatpush3.bf16.msra.mxu1 %v1087_v6  ;;  %1009 = vmatprep.subr.bf16.mxu0 %v1088_v7  ;;  %v1101_v20 = vld [vmem:[%s1563_s1 + $0x30] sm:$0xff]   ;;  %v915_v24 = vcombine.high %v28_v21, %v28_v21  ;;  %v1104_v25 = vld [vmem:[%s1563_s1 + $0x38] sm:$0xff]   ;;  %v1111_v27 = vld [vmem:[%s1565_s3 + $0x4] ss:$8 sps:$4 sm:$0xff]   ;;  %v914_v28 = vcombine.low %v28_v21, %v28_v21 }
   0x9   :  { %1062 = vmatprep.subr.bf16.mxu1 %v1227_v2  ;;  %v1102_v22 = vld [vmem:[%s1563_s1 + $0xb0] sm:$0xff]   ;;  %v1107_v26 = vld [vmem:[%s1563_s1 + $0xb8] sm:$0xff]   ;;  %v1108_v29 = vld [vmem:[%s1562_s0 + $0x8] ss:$0 sps:$4 sm:$0xff]  }
   0xa   :  { %272 = vmatprep.mubr.bf16.mxu0 %v915_v24  ;;  %v1109_v30 = vld [vmem:[%s1565_s3] ss:$8 sps:$4 sm:$0xff]   ;;  %v1114_v31 = vld [vmem:[%s1565_s3 + $0x14] ss:$8 sps:$4 sm:$0xff]   ;;  %v1112_v32 = vld [vmem:[%s1565_s3 + $0x10] ss:$8 sps:$4 sm:$0xff]  }
   0xb   :  { %1010 = vmatpush3.bf16.msra.mxu0 %v1089_v8  ;;  %v1117_v33 = vld [vmem:[%s1565_s3 + $0x24] ss:$8 sps:$4 sm:$0xff]   ;;  %v1115_v34 = vld [vmem:[%s1565_s3 + $0x20] ss:$8 sps:$4 sm:$0xff]   ;;  %v1120_v35 = vld [vmem:[%s1565_s3 + $0x34] ss:$8 sps:$4 sm:$0xff]  }
   0xc   :  { %1063 = vmatpush3.bf16.msra.mxu1 %v1090_v9  ;;  %1011 = vmatprep.subr.bf16.mxu0 %v1091_v10  ;;  %v1118_v36 = vld [vmem:[%s1565_s3 + $0x30] ss:$8 sps:$4 sm:$0xff]   ;;  %v1123_v37 = vld [vmem:[%s1565_s3 + $0x44] ss:$8 sps:$4 sm:$0xff]   ;;  %v1121_v38 = vld [vmem:[%s1565_s3 + $0x40] ss:$8 sps:$4 sm:$0xff]  }
   0xd   :  { %1064 = vmatprep.subr.bf16.mxu1 %v1227_v2 }
   0xf   :  { %1012 = vmatpush3.bf16.msra.mxu0 %v1092_v11 }
  0x10   :  { %1065 = vmatpush3.bf16.msra.mxu1 %v1093_v12  ;;  %1013 = vmatprep.subr.bf16.mxu0 %v1094_v13 }
  0x11   :  { %1066 = vmatprep.subr.bf16.mxu1 %v1227_v2 }
  0x13   :  { %1014 = vmatpush3.bf16.msra.mxu0 %v1095_v14 }
  0x14   :  { %1067 = vmatpush3.bf16.msra.mxu1 %v1096_v15  ;;  %1015 = vmatprep.subr.bf16.mxu0 %v1097_v16 }
  0x15   :  { %1068 = vmatprep.subr.bf16.mxu1 %v1227_v2 }
  0x17   :  { %1016 = vmatpush3.bf16.msra.mxu0 %v1098_v17 }
  0x18   :  { %1069 = vmatpush3.bf16.msra.mxu1 %v1099_v18  ;;  %1017 = vmatprep.subr.bf16.mxu0 %v1100_v19 }
  0x19   :  { %1070 = vmatprep.subr.bf16.mxu1 %v1227_v2 }
  0x1b   :  { %1018 = vmatpush3.bf16.msra.mxu0 %v1101_v20 }
  0x1c   :  { %1071 = vmatpush3.bf16.msra.mxu1 %v1102_v22  ;;  %1019 = vmatprep.subr.bf16.mxu0 %v1103_v23 }
  0x1d   :  { %1072 = vmatprep.subr.bf16.mxu1 %v1227_v2 }
  0x1f   :  { %1020 = vmatpush3.bf16.msra.mxu0 %v1104_v25 }
  0x20   :  { %1073 = vmatpush3.bf16.msra.mxu1 %v1107_v26  ;;  %430 = vmatprep.subr.bf16.mxu0 %v1111_v27 }
  0x22   :  { %273 = vmatmul.mubr.bf16.vlgmr.msra.gmra.mrb[0].mxu0 %v914_v28 }
  0x23   :  { %1075 = vmatmul.mubr.bf16.vlgmr.msra.gmra.mrb[0].mxu1 %v1108_v29  ;;  %431 = vmatpush1.bf16.msra.mxu0 %v1109_v30 }
  0x24   :  { %432 = vmatprep.subr.bf16.mxu0 %v1114_v31 }
  0x27   :  { %433 = vmatpush1.bf16.msra.mxu0 %v1112_v32 }
  0x28   :  { %434 = vmatprep.subr.bf16.mxu0 %v1117_v33 }
  0x2b   :  { %435 = vmatpush1.bf16.msra.mxu0 %v1115_v34 }
  0x2c   :  { %436 = vmatprep.subr.bf16.mxu0 %v1120_v35 }
  0x2f   :  { %437 = vmatpush1.bf16.msra.mxu0 %v1118_v36 }
  0x30   :  { %438 = vmatprep.subr.bf16.mxu0 %v1123_v37 }
  0x33   :  { %439 = vmatpush1.bf16.msra.mxu0 %v1121_v38 }
  0x34   :  { %12 = vsyncpa [#allocation3], 0  ;;  %v1126_v39 = vld [vmem:[%s1565_s3 + $0x54] ss:$8 sps:$4 sm:$0xff]   ;;  %v1124_v40 = vld [vmem:[%s1565_s3 + $0x50] ss:$8 sps:$4 sm:$0xff]  }
  0x35   :  { %440 = vmatprep.subr.bf16.mxu0 %v1126_v39  ;;  %v1129_v41 = vld [vmem:[%s1565_s3 + $0x64] ss:$8 sps:$4 sm:$0xff]   ;;  %v1127_v42 = vld [vmem:[%s1565_s3 + $0x60] ss:$8 sps:$4 sm:$0xff]   ;;  %v1132_v43 = vld [vmem:[%s1565_s3 + $0x74] ss:$8 sps:$4 sm:$0xff]  }
  0x36   :  { %v1130_v44 = vld [vmem:[%s1565_s3 + $0x70] ss:$8 sps:$4 sm:$0xff]   ;;  %v1229_v45 = vmov 0   ;;  %v1133_v46 = vld [vmem:[%s1567_s5] ss:$12 sps:$4 sm:$0xff]  }
  0x37   :  { %441 = vmatpush1.bf16.msra.mxu0 %v1124_v40  ;;  %462 = vmatprep.mubr.bf16.mxu0 %v1229_v45  ;;  %v1135_v47 = vld [vmem:[%s1567_s5 + $0x4] ss:$12 sps:$4 sm:$0xff]   ;;  %v1138_v48 = vld [vmem:[%s1567_s5 + $0x1c] ss:$12 sps:$4 sm:$0xff]   ;;  %v1141_v50 = vld [vmem:[%s1567_s5 + $0x34] ss:$12 sps:$4 sm:$0xff]  }
  0x38   :  { %442 = vmatprep.subr.bf16.mxu0 %v1129_v41  ;;  %812 = vmatprep.subr.bf16.mxu1 %v1135_v47  ;;  %v1136_v49 = vld [vmem:[%s1567_s5 + $0x18] ss:$12 sps:$4 sm:$0xff]   ;;  %v1160_v51 = vld [vmem:[%s1567_s5 + $0xc8] ss:$12 sps:$4 sm:$0xff]   ;;  %v1139_v52 = vld [vmem:[%s1567_s5 + $0x30] ss:$12 sps:$4 sm:$0xff]  }
  0x39   :  { %813 = vmatpush1.bf16.msra.mxu1 %v1133_v46  ;;  %v1144_v53 = vld [vmem:[%s1567_s5 + $0x4c] ss:$12 sps:$4 sm:$0xff]   ;;  %v1142_v54 = vld [vmem:[%s1567_s5 + $0x48] ss:$12 sps:$4 sm:$0xff]   ;;  %v1147_v55 = vld [vmem:[%s1567_s5 + $0x64] ss:$12 sps:$4 sm:$0xff]  }
  0x3a   :  { %814 = vmatprep.subr.bf16.mxu1 %v1138_v48  ;;  %v1145_v56 = vld [vmem:[%s1567_s5 + $0x60] ss:$12 sps:$4 sm:$0xff]   ;;  %v1150_v57 = vld [vmem:[%s1567_s5 + $0x7c] ss:$12 sps:$4 sm:$0xff]   ;;  %v1148_v58 = vld [vmem:[%s1567_s5 + $0x78] ss:$12 sps:$4 sm:$0xff]  }
  0x3b   :  { %443 = vmatpush1.bf16.msra.mxu0 %v1127_v42  ;;  %v1153_v59 = vld [vmem:[%s1567_s5 + $0x94] ss:$12 sps:$4 sm:$0xff]   ;;  %v1151_v60 = vld [vmem:[%s1567_s5 + $0x90] ss:$12 sps:$4 sm:$0xff]   ;;  %v1156_v61 = vld [vmem:[%s1567_s5 + $0xac] ss:$12 sps:$4 sm:$0xff]  }
  0x3c   :  { %444 = vmatprep.subr.bf16.mxu0 %v1132_v43  ;;  %v1154_v62 = vld [vmem:[%s1567_s5 + $0xa8] ss:$12 sps:$4 sm:$0xff]   ;;  %v1159_v63 = vld [vmem:[%s1567_s5 + $0xc4] ss:$12 sps:$4 sm:$0xff]   ;;  %v1157_v0 = vld [vmem:[%s1567_s5 + $0xc0] ss:$12 sps:$4 sm:$0xff]  }
  0x3d   :  { %815 = vmatpush1.bf16.msra.mxu1 %v1136_v49  ;;  %v1164_v1 = vld [vmem:[%s1567_s5 + $0xdc] ss:$12 sps:$4 sm:$0xff]   ;;  %v1162_v2 = vld [vmem:[%s1567_s5 + $0xd8] ss:$12 sps:$4 sm:$0xff]   ;;  %v1169_v3 = vld [vmem:[%s1567_s5 + $0xf4] ss:$12 sps:$4 sm:$0xff]  }
  0x3e   :  { %816 = vmatprep.subr.bf16.mxu1 %v1141_v50  ;;  %v1167_v4 = vld [vmem:[%s1567_s5 + $0xf0] ss:$12 sps:$4 sm:$0xff]   ;;  %v1174_v5 = vld [vmem:[%s1567_s5 + $0x10c] ss:$12 sps:$4 sm:$0xff]   ;;  %v1172_v6 = vld [vmem:[%s1567_s5 + $0x108] ss:$12 sps:$4 sm:$0xff]  }
  0x3f   :  { %445 = vmatpush1.bf16.msra.mxu0 %v1130_v44  ;;  %v1179_v7 = vld [vmem:[%s1567_s5 + $0x124] ss:$12 sps:$4 sm:$0xff]   ;;  %v1177_v8 = vld [vmem:[%s1567_s5 + $0x120] ss:$12 sps:$4 sm:$0xff]   ;;  %v1184_v9 = vld [vmem:[%s1567_s5 + $0x13c] ss:$12 sps:$4 sm:$0xff]   ;;  %v340_v44 = vlaneseq }
  0x40   :  { %1036 = vmatprep.subr.bf16.mxu0 %v1160_v51  ;;  %v1182_v10 = vld [vmem:[%s1567_s5 + $0x138] ss:$12 sps:$4 sm:$0xff]   ;;  %v913_v13 = vld [vmem:[%s1564_s2] ss:$0 sm:$0xff]  ;;  %v1161_v24 = vld [vmem:[%s1567_s5 + $0x8] ss:$12 sps:$4 sm:$0xff]  }
  0x41   :  { %817 = vmatpush1.bf16.msra.mxu1 %v1139_v52  ;;  %v1165_v26 = vld [vmem:[%s1567_s5 + $0xe0] ss:$12 sps:$4 sm:$0xff]   ;;  %v1170_v28 = vld [vmem:[%s1567_s5 + $0xf8] ss:$12 sps:$4 sm:$0xff]   ;;  %v1175_v30 = vld [vmem:[%s1567_s5 + $0x110] ss:$12 sps:$4 sm:$0xff]  }
  0x42   :  { %818 = vmatprep.subr.bf16.mxu1 %v1144_v53  ;;  %v1166_v27 = vld [vmem:[%s1567_s5 + $0x20] ss:$12 sps:$4 sm:$0xff]   ;;  %v1171_v29 = vld [vmem:[%s1567_s5 + $0x38] ss:$12 sps:$4 sm:$0xff]   ;;  %v1176_v31 = vld [vmem:[%s1567_s5 + $0x50] ss:$12 sps:$4 sm:$0xff]  }
  0x43   :  { %v1180_v32 = vld [vmem:[%s1567_s5 + $0x128] ss:$12 sps:$4 sm:$0xff]   ;;  %v1185_v34 = vld [vmem:[%s1567_s5 + $0x140] ss:$12 sps:$4 sm:$0xff]   ;;  %v1190_v37 = vld [vmem:[%s1567_s5 + $0x158] ss:$12 sps:$4 sm:$0xff]  }
  0x44   :  { %v1181_v33 = vld [vmem:[%s1567_s5 + $0x68] ss:$12 sps:$4 sm:$0xff]   ;;  %v1186_v35 = vld [vmem:[%s1567_s5 + $0x80] ss:$12 sps:$4 sm:$0xff]   ;;  %v1187_v38 = vld [vmem:[%s1567_s5 + $0x150] ss:$12 sps:$4 sm:$0xff]  }
  0x45   :  { %819 = vmatpush1.bf16.msra.mxu1 %v1142_v54  ;;  %v1189_v36 = vld [vmem:[%s1567_s5 + $0x154] ss:$12 sps:$4 sm:$0xff]   ;;  %v1191_v39 = vld [vmem:[%s1567_s5 + $0x98] ss:$12 sps:$4 sm:$0xff]   ;;  %v1195_v41 = vld [vmem:[%s1567_s5 + $0x170] ss:$12 sps:$4 sm:$0xff]  }
  0x46   :  { %820 = vmatprep.subr.bf16.mxu1 %v1147_v55  ;;  %v1194_v40 = vld [vmem:[%s1567_s5 + $0x16c] ss:$12 sps:$4 sm:$0xff]   ;;  %v1192_v42 = vld [vmem:[%s1567_s5 + $0x168] ss:$12 sps:$4 sm:$0xff]   ;;  %v1196_v43 = vld [vmem:[%s1567_s5 + $0xb0] ss:$12 sps:$4 sm:$0xff]  }
  0x47   :  { %v341_v45 = vshrl.u32 %v340_v44, 7  ;;  %v338_v47 = vld [vmem:[%s1566_s4] sm:$0x3]  ;;  %s1230_s4 = smov [#allocation2]  }
  0x49   :  { %821 = vmatpush1.bf16.msra.mxu1 %v1145_v56  ;;  %v342_v46 = vsub.s32 0, %v341_v45  ;;  %v346_v48 = vsub.s32 1, %v341_v45 }
  0x4a   :  { %822 = vmatprep.subr.bf16.mxu1 %v1150_v57 }
  0x4b   :  { %v343_v49 = vrot.slane %v338_v47, %v342_v46  ;;  %v347_v50 = vrot.slane %v338_v47, %v346_v48 }
  0x4d   :  { %823 = vmatpush1.bf16.msra.mxu1 %v1148_v58 }
  0x4e   :  { %824 = vmatprep.subr.bf16.mxu1 %v1153_v59 }
  0x51   :  { %825 = vmatpush1.bf16.msra.mxu1 %v1151_v60 }
  0x52   :  { %826 = vmatprep.subr.bf16.mxu1 %v1156_v61  ;;  %v539_v61 = vld [vmem:[%s1568_s6] sm:$0x7]  ;;  %s905_s6 = sshll.u32 %s1230_s4, 4  ;;  %s906_s6 = int_to_ptr.vmem [resolvable:$true] %s905_s6 }
  0x53   :  { %s1203_s9 = scalar_lea.vmem %s906_s6, 384  ;;  %p1208_p1 = scmp.lt.s32.totalorder %s906_s6, %s906_s6 }
  0x54   :  { %p1204_p0 = scmp.ne.s32.totalorder %s906_s6, %s1203_s9  ;;  %p1209_p2 = scmp.lt.s32.totalorder %s1203_s9, %s1203_s9 }
  0x55   :  { %827 = vmatpush1.bf16.msra.mxu1 %v1154_v62  ;;  %v551_v62 = vsub.s32 2, %v341_v45 }
  0x56   :  { %828 = vmatprep.subr.bf16.mxu1 %v1159_v63  ;;  %v544_v63 = vrot.slane %v539_v61, %v342_v46  ;;  %p1210_p3 = por %p1209_p2, %p1208_p1 }
  0x58   :  { %p1211_p4 = pnand %p1210_p3, %p1204_p0 }
  0x59   :  { %829 = vmatpush1.bf16.msra.mxu1 %v1157_v0  ;;  %v548_v0 = vrot.slane %v539_v61, %v346_v48 }
  0x5a   :  { %830 = vmatprep.subr.bf16.mxu1 %v1164_v1 }
  0x5d   :  { %831 = vmatpush1.bf16.msra.mxu1 %v1162_v2 }
  0x5e   :  { %832 = vmatprep.subr.bf16.mxu1 %v1169_v3  ;;  %v552_v3 = vrot.slane %v539_v61, %v551_v62 }
  0x61   :  { %833 = vmatpush1.bf16.msra.mxu1 %v1167_v4 }
  0x62   :  { %834 = vmatprep.subr.bf16.mxu1 %v1174_v5 }
  0x65   :  { %835 = vmatpush1.bf16.msra.mxu1 %v1172_v6 }
  0x66   :  { %836 = vmatprep.subr.bf16.mxu1 %v1179_v7 }
  0x69   :  { %837 = vmatpush1.bf16.msra.mxu1 %v1177_v8 }
  0x6a   :  { %838 = vmatprep.subr.bf16.mxu1 %v1184_v9 }
  0x6d   :  { %839 = vmatpush1.bf16.msra.mxu1 %v1182_v10 }
  0x6e   :  { %840 = vmatprep.subr.bf16.mxu1 %v1189_v36 }
  0x71   :  { %841 = vmatpush1.bf16.msra.mxu1 %v1187_v38 }
  0x72   :  { %842 = vmatprep.subr.bf16.mxu1 %v1194_v40 }
  0x75   :  { %843 = vmatpush1.bf16.msra.mxu1 %v1192_v42 }
  0xf5   :  { %v1021_v11 = vpop.f32.mrb[0].mxu0 }
  0xf6   :  { %v1022_v12 = vpop.f32.mrb[1].mxu0  ;;  %v314_v14 = vpop.f32.mrb[0].mxu1 }
  0xf7   :  { %v1023_v15 = vadd.f32 %v1022_v12, %v1021_v11  ;;  %v1024_v16 = vpop.f32.mrb[2].mxu0  ;;  %v1076_v17 = vpop.f32.mrb[1].mxu1 }
  0xf8   :  { %v1025_v18 = vpop.f32.mrb[3].mxu0  ;;  %v317_v19 = vpop.f32.mrb[2].mxu1 }
  0xf9   :  { %v275_v20 = vadd.f32 %v1023_v15, %v913_v13  ;;  %v1077_v21 = vpop.f32.mrb[3].mxu1 }
  0xfb   :  { %v315_v22 = vadd.f32 %v314_v14, %v275_v20 }
  0xfd   :  { %v320_v23 = vmax.f32 %v315_v22, 0.0 }
  0xff   :  { %v321_v25 = vpack.c.bf16 %v320_v23, %v320_v23 }
 0x101   :  { %463 = vmatmul.mubr.bf16.vlgmr.msra.gmra.mrb[4].mxu0 %v321_v25 }
 0x102   :  { %1037 = vmatpush3.bf16.msra.mxu0 %v1161_v24 }
 0x103   :  { %1038 = vmatprep.subr.bf16.mxu0 %v1165_v26 }
 0x106   :  { %1039 = vmatpush3.bf16.msra.mxu0 %v1166_v27 }
 0x107   :  { %1040 = vmatprep.subr.bf16.mxu0 %v1170_v28 }
 0x10a   :  { %1041 = vmatpush3.bf16.msra.mxu0 %v1171_v29 }
 0x10b   :  { %1042 = vmatprep.subr.bf16.mxu0 %v1175_v30 }
 0x10e   :  { %1043 = vmatpush3.bf16.msra.mxu0 %v1176_v31 }
 0x10f   :  { %1044 = vmatprep.subr.bf16.mxu0 %v1180_v32 }
 0x112   :  { %1045 = vmatpush3.bf16.msra.mxu0 %v1181_v33 }
 0x113   :  { %1046 = vmatprep.subr.bf16.mxu0 %v1185_v34 }
 0x116   :  { %1047 = vmatpush3.bf16.msra.mxu0 %v1186_v35 }
 0x117   :  { %1048 = vmatprep.subr.bf16.mxu0 %v1190_v37 }
 0x11a   :  { %1049 = vmatpush3.bf16.msra.mxu0 %v1191_v39 }
 0x11b   :  { %1050 = vmatprep.subr.bf16.mxu0 %v1195_v41 }
 0x11e   :  { %1051 = vmatpush3.bf16.msra.mxu0 %v1196_v43 }
 0x1d4   :  { %v464_v51 = vpop.f32.mrb[4].mxu0 }
 0x1d5   :  { %v465_v52 = vadd.f32 %v464_v51, %v343_v49  ;;  %v466_v53 = vpop.f32.mrb[5].mxu0 }
 0x1d6   :  { %v467_v54 = vadd.f32 %v466_v53, %v347_v50  ;;  %v468_v55 = vpop.f32.mrb[6].mxu0 }
 0x1d7   :  { %v471_v56 = vmax.f32 %v465_v52, 0.0  ;;  %v469_v57 = vpop.f32.mrb[7].mxu0 }
 0x1d8   :  { %v472_v58 = vmax.f32 %v467_v54, 0.0 }
 0x1d9   :  { %v473_v60 = vpack.c.bf16 %v471_v56, %v471_v56 }
 0x1da   :  { %v474_v59 = vpack.c.bf16 %v472_v58, %v472_v58 }
 0x1dc   :  { %844 = vmatprep.mubr.bf16.mxu1 %v474_v59  ;;  %885 = vmatprep.mubr.bf16.mxu0 %v474_v59 }
 0x1dd   :  { %845 = vmatmul.mubr.bf16.vlgmr.msra.gmra.mrb[4].mxu1 %v473_v60  ;;  %886 = vmatmul.mubr.bf16.vlgmr.msra.gmra.mrb[8].mxu0 %v473_v60 }
 0x2b0   :  { %v846_v1 = vpop.f32.mrb[4].mxu1  ;;  %v1052_v2 = vpop.f32.mrb[8].mxu0 }
 0x2b1   :  { %v847_v4 = vadd.f32 %v846_v1, %v544_v63  ;;  %v848_v5 = vpop.f32.mrb[5].mxu1  ;;  %v1053_v6 = vpop.f32.mrb[9].mxu0 }
 0x2b2   :  { %v849_v7 = vadd.f32 %v848_v5, %v548_v0  ;;  %v1054_v8 = vadd.f32 %v1053_v6, %v1052_v2  ;;  %v850_v9 = vpop.f32.mrb[6].mxu1  ;;  %v1055_v10 = vpop.f32.mrb[10].mxu0 }
 0x2b3   :  { %1197 = vtanh.f32 %v847_v4  ;;  %v851_v11 = vpop.f32.mrb[7].mxu1  ;;  %v1056_v12 = vpop.f32.mrb[11].mxu0 }
 0x2b4   :  { %1199 = vtanh.f32 %v849_v7  ;;  %v888_v13 = vadd.f32 %v1054_v8, %v552_v3 }
 0x2b6   :  { %1201 = vtanh.f32 %v888_v13 }
 0x2bd   :  { %v1198_v14 = vpop.eup %1197 }
 0x2be   :  { %v1200_v15 = vpop.eup %1199  ;;  %896 = vst [vmem:[#allocation2] sm:$0xff] %v1198_v14 }
 0x2bf   :  { %897 = vst [vmem:[#allocation2 + $0x8] sm:$0xff] %v1200_v15 }
 0x2c0   :  { %v1202_v16 = vpop.eup %1201 }
 0x2c1   :  { %898 = vst [vmem:[#allocation2 + $0x10] sm:$0xff] %v1202_v16 }
 0x2c2   :  { %1214 = shalt.err (!%p1211_p4)
}
 0x2c3   :  { %s1215_s12 = scalar_lea.hbm %s1569_s7, 384 }
 0x2c4   :  { %p1216_p5 = scmp.ne.s32.totalorder %s1569_s7, %s1215_s12  ;;  %p1219_p6 = scmp.lt.u32.totalorder %s1215_s12, %s1569_s7 }
 0x2c6   :  { %p1221_p7 = pnand %p1219_p6, %p1216_p5 }
 0x2c8   :  { %1224 = shalt.err (!%p1221_p7)
}
 0x2c9   :  { %908 = dma.vmem_to_hbm [thread:$0]  %s906_s6, 384, %s1569_s7, [#allocation3]  }
 0x2ca   :  { %1225 = dma.done.wait [#allocation3], 384  }
 0x2cb   :  { %1226 = vsyncadd [#allocation3], 4294966912 }
 0x2cc   :  { %912 = vsyncpa [#allocation3], 1 }

</bundles_post_ra>
